<compile_context>
chip_gen: v5e
topology: v5e:2x2
jax: 0.10.0
libtpu: 0.0.40
codegen_flags: <defaults>
</compile_context>

<pallas_src>
import math
import jax
import jax.numpy as jnp
from jax.experimental import pallas as pl
from jax.experimental.pallas import tpu as pltpu


def _prolog_matmul_kernel(x_ref, w2_ref, o_ref):
    # x_ref: (TB, K), w2_ref: (TN, K), o_ref: (TB, TN)
    # out[b, n] = sum_k x[b, k] * W2[n, k]   -> single MXU matmul, f32 accumulate.
    o_ref[...] = jax.lax.dot_general(
        x_ref[...], w2_ref[...],
        dimension_numbers=(((1,), (1,)), ((), ())),
        preferred_element_type=jnp.float32,
    ).astype(o_ref.dtype)


def _pick_tile(total, target, align):
    """Largest tile <= target that is a multiple of `align` and divides `total`
    (or the full dim if `total` is already small)."""
    if total <= target:
        return total
    t = (target // align) * align
    while t >= align:
        if total % t == 0:
            return t
        t -= align
    return total  # fallback: full dimension


def prolog_layer(x, weight, basis):
    """x: [B, K] f32, weight: [C, K] f32, basis: [C, 4, 4] f32 -> [B, C, 4, 4] f32."""
    B, K = x.shape
    C = weight.shape[0]
    N = C * 16

    # One-time weight transform, done in f32 (fuse before any casting to avoid
    # double rounding): W2[c*16 + p, k] = weight[c, k] * basis[c, p]
    w2 = (weight[:, None, :] * basis.reshape(C, 16)[:, :, None]).reshape(N, K)
    w2 = w2.astype(x.dtype)

    # Tile the batch axis (sublane-aligned) and the lane-dense output axis
    # (128-aligned). Targets chosen so 2x double-buffered tiles stay well under
    # v7x's 64 MiB VMEM even for large B/C.
    TB = _pick_tile(B, 256, 8)
    TN = _pick_tile(N, 512, 128)
    grid = (B // TB, N // TN)

    # Explicit VMEM budget: double-buffered x tile + W2 tile + output tile.
    itemsize = jnp.dtype(x.dtype).itemsize
    vmem_bytes = 2 * (TB * K + TN * K + TB * TN) * itemsize + (2 << 20)
    vmem_bytes = int(min(max(vmem_bytes, 4 << 20), 48 << 20))

    out_flat = pl.pallas_call(
        _prolog_matmul_kernel,
        out_shape=jax.ShapeDtypeStruct((B, N), x.dtype),
        grid=grid,
        in_specs=[
            pl.BlockSpec((TB, K), lambda i, j: (i, 0)),   # x tile: varies with B only
            pl.BlockSpec((TN, K), lambda i, j: (j, 0)),   # fused weight tile: varies with N only
        ],
        out_specs=pl.BlockSpec((TB, TN), lambda i, j: (i, j)),
        compiler_params=pltpu.CompilerParams(
            dimension_semantics=("parallel", "parallel"),
            vmem_limit_bytes=vmem_bytes,
        ),
    )(x, w2)

    # out_flat[b, c*16 + p] == s[b, c] * basis_flat[c, p]  ->  [B, C, 4, 4]
    return out_flat.reshape(B, C, 4, 4)


def init_params(key, input_units, output_channels):
    k_w, k_b = jax.random.split(key)
    # MSRInitializer: FanIn = InputUnits (Linear), gain=1, std = 1/sqrt(FanIn)
    std = 1.0 / math.sqrt(input_units)
    weight = std * jax.random.normal(k_w, (output_channels, input_units), jnp.float32)
    basis = jax.random.normal(k_b, (output_channels, 4, 4), jnp.float32)
    return weight, basis


if __name__ == "__main__":
    B, INPUT_UNITS, OUT_CHANNELS = 2, 32, 8

    key = jax.random.PRNGKey(0)
    k_x, k_p = jax.random.split(key)
    x = jax.random.normal(k_x, (B, INPUT_UNITS), jnp.float32)
    weight, basis = init_params(k_p, INPUT_UNITS, OUT_CHANNELS)

    out = prolog_layer(x, weight, basis)
    out = jax.block_until_ready(out)

    # Reference check in plain JAX (same math as the PyTorch forward)
    ref = basis.reshape(1, OUT_CHANNELS, 4, 4) * (x @ weight.T).reshape(B, OUT_CHANNELS, 1, 1)
    assert out.shape == (B, OUT_CHANNELS, 4, 4)
    assert jnp.allclose(out, ref, atol=1e-4, rtol=1e-4)

    print("KERNEL_OK")
</pallas_src>

<mosaic_0001>
module attributes {stable_mosaic.version = 11 : i64} {
  func.func @_prolog_matmul_kernel(%arg0: i32, %arg1: i32, %arg2: memref<2x32xf32, #tpu.memory_space<vmem>>, %arg3: memref<128x32xf32, #tpu.memory_space<vmem>>, %arg4: memref<2x128xf32, #tpu.memory_space<vmem>>) attributes {dimension_semantics = [#tpu.dimension_semantics<parallel>, #tpu.dimension_semantics<parallel>], iteration_bounds = array<i64: 1, 1>, scalar_prefetch = 0 : i64, scratch_operands = 0 : i64, tpu.core_type = #tpu.core_type<tc>, window_params = [{transform_indices = @transform_0, window_bounds = array<i64: 2, 32>}, {transform_indices = @transform_1, window_bounds = array<i64: 128, 32>}, {transform_indices = @transform_2, window_bounds = array<i64: 2, 128>}]} {
    %c0 = arith.constant 0 : index
    %c0_0 = arith.constant 0 : index
    %0 = vector.load %arg2[%c0, %c0_0] : memref<2x32xf32, #tpu.memory_space<vmem>>, vector<2x32xf32>
    %c0_1 = arith.constant 0 : index
    %c0_2 = arith.constant 0 : index
    %1 = vector.load %arg3[%c0_1, %c0_2] : memref<128x32xf32, #tpu.memory_space<vmem>>, vector<128x32xf32>
    %cst = arith.constant dense<0.000000e+00> : vector<2x128xf32>
    %2 = tpu.matmul %0, %1, %cst {dimension_numbers = #tpu.dot_dimension_numbers<[1], [1], [0], [0], [0, 0, 1, 0], [], []>} : vector<2x32xf32>, vector<128x32xf32>, vector<2x128xf32> -> vector<2x128xf32>
    %c0_3 = arith.constant 0 : index
    %c0_4 = arith.constant 0 : index
    %3 = vector.load %arg4[%c0_3, %c0_4] : memref<2x128xf32, #tpu.memory_space<vmem>>, vector<2x128xf32>
    tpu.vector_store %arg4[%c0_3, %c0_4], %2 {strides = array<i32>} : memref<2x128xf32, #tpu.memory_space<vmem>>, vector<2x128xf32>,
    return
  }
  func.func @transform_0(%arg0: i32, %arg1: i32) -> (i32, i32) {
    %c0_i32 = arith.constant 0 : i32
    %c0_i32_0 = arith.constant 0 : i32
    return %arg0, %c0_i32 : i32, i32
  }
  func.func @transform_1(%arg0: i32, %arg1: i32) -> (i32, i32) {
    %c0_i32 = arith.constant 0 : i32
    %c0_i32_0 = arith.constant 0 : i32
    return %arg1, %c0_i32 : i32, i32
  }
  func.func @transform_2(%arg0: i32, %arg1: i32) -> (i32, i32) {
    %c0_i32 = arith.constant 0 : i32
    return %arg0, %arg1 : i32, i32
  }
}

</mosaic_0001>

<bundles_post_ra>
// kernel: tpu_custom_call.1
= control target key start
LH: loop header
LB: loop body
LE: loop exit
PB: predicated region body
PF: predicated region fallthrough
CT: control target
= control target key end

     0   :  { %vm29_vm0 = vcmask 261120   ;;  %s249_s0 = inlined_call_operand.vmem [shape: f32[2,32], index: 0, kind: input, shape index: {}]   ;;  %s250_s1 = inlined_call_operand.vmem [shape: f32[128,32], index: 1, kind: input, shape index: {}]   ;;  %s251_s2 = inlined_call_operand.hbm [shape: f32[2,128], index: 2, kind: output, shape index: {}]  }
   0x1   :  { %v28_v0 = vld [vmem:[%s250_s1 + $0x78] sm:$0xff]  ;;  %v27_v1 = vld [vmem:[%s250_s1 + $0x70] sm:$0xff] }
   0x2   :  { %118 = vmatpush.xpose.msk.msra.mxu0 %vm29_vm0, %v28_v0 }
   0x3   :  { %7 = vsyncpa [#allocation3], 0  ;;  %v26_v2 = vld [vmem:[%s250_s1 + $0x68] sm:$0xff]  ;;  %v25_v3 = vld [vmem:[%s250_s1 + $0x60] sm:$0xff]  ;;  %s162_s15 = smov [#allocation2]   ;;  %s109_s19 = sshll.u32 %s251_s2, 4  ;;  %s110_s19 = int_to_ptr.hbm [resolvable:$true] %s109_s19 }
   0x4   :  { %v24_v4 = vld [vmem:[%s250_s1 + $0x58] sm:$0xff]  ;;  %v23_v5 = vld [vmem:[%s250_s1 + $0x50] sm:$0xff]  ;;  %v22_v6 = vld [vmem:[%s250_s1 + $0x48] sm:$0xff]  ;;  %s107_s16 = sshll.u32 %s162_s15, 4  ;;  %s108_s16 = int_to_ptr.vmem [resolvable:$true] %s107_s16 }
   0x5   :  { %v21_v7 = vld [vmem:[%s250_s1 + $0x40] sm:$0xff]  ;;  %v20_v8 = vld [vmem:[%s250_s1 + $0x38] sm:$0xff]  ;;  %v19_v9 = vld [vmem:[%s250_s1 + $0x30] sm:$0xff] }
   0x6   :  { %119 = vmatpush.xpose.msk.msra.mxu0 %vm29_vm0, %v27_v1  ;;  %v18_v10 = vld [vmem:[%s250_s1 + $0x28] sm:$0xff]  ;;  %v17_v11 = vld [vmem:[%s250_s1 + $0x20] sm:$0xff]  ;;  %v16_v12 = vld [vmem:[%s250_s1 + $0x18] sm:$0xff] }
   0x7   :  { %v15_v13 = vld [vmem:[%s250_s1 + $0x10] sm:$0xff]  ;;  %v14_v14 = vld [vmem:[%s250_s1 + $0x8] sm:$0xff]  ;;  %v13_v15 = vld [vmem:[%s250_s1] sm:$0xff] }
   0x8   :  { %v12_v16 = vld [vmem:[%s249_s0] sm:$0x3] }
   0xa   :  { %120 = vmatpush.xpose.msk.msra.mxu0 %vm29_vm0, %v26_v2 }
   0xe   :  { %121 = vmatpush.xpose.msk.msra.mxu0 %vm29_vm0, %v25_v3 }
  0x12   :  { %122 = vmatpush.xpose.msk.msra.mxu0 %vm29_vm0, %v24_v4 }
  0x16   :  { %123 = vmatpush.xpose.msk.msra.mxu0 %vm29_vm0, %v23_v5 }
  0x1a   :  { %124 = vmatpush.xpose.msk.msra.mxu0 %vm29_vm0, %v22_v6 }
  0x1e   :  { %125 = vmatpush.xpose.msk.msra.mxu0 %vm29_vm0, %v21_v7 }
  0x22   :  { %126 = vmatpush.xpose.msk.msra.mxu0 %vm29_vm0, %v20_v8 }
  0x26   :  { %127 = vmatpush.xpose.msk.msra.mxu0 %vm29_vm0, %v19_v9 }
  0x2a   :  { %128 = vmatpush.xpose.msk.msra.mxu0 %vm29_vm0, %v18_v10 }
  0x2e   :  { %129 = vmatpush.xpose.msk.msra.mxu0 %vm29_vm0, %v17_v11 }
  0x32   :  { %130 = vmatpush.xpose.msk.msra.mxu0 %vm29_vm0, %v16_v12 }
  0x36   :  { %131 = vmatpush.xpose.msk.msra.mxu0 %vm29_vm0, %v15_v13 }
  0x3a   :  { %132 = vmatpush.xpose.msk.msra.mxu0 %vm29_vm0, %v14_v14 }
  0x3e   :  { %133 = vmatpush.xpose.msk.msra.mxu0 %vm29_vm0, %v13_v15 }
  0x41   :  { %134 = vmatmul.msk.f32.vlgmr.msra.gmra.mxu0 %vm29_vm0, %v12_v16 }
  0xbe   :  { %v98_v17 = vpop.f32.mrf.mxu0 }
  0xbf   :  { %101 = vst [vmem:[#allocation2] sm:$0x3] %v98_v17 }
  0xc0   :  { %112 = dma.vmem_to_hbm [thread:$0]  %s108_s16, 32, %s110_s19, [#allocation3]  }
  0xc1   :  { %160 = dma.done.wait [#allocation3], 32  }
  0xc2   :  { %161 = vsyncadd [#allocation3], 4294967264 }
  0xc3   :  { %117 = vsyncpa [#allocation3], 1 }

</bundles_post_ra>
